<compile_context>
chip_gen: v5e
topology: v5e:2x2
jax: 0.10.0
libtpu: 0.0.40
codegen_flags: <defaults>
</compile_context>

<pallas_src>
import functools

import jax
import jax.numpy as jnp
from jax.experimental import pallas as pl
from jax.experimental.pallas import tpu as pltpu

_LANE = 128


def _round_up(x: int, m: int) -> int:
    return ((x + m - 1) // m) * m


def _pad2(a, rows: int, cols: int):
    return jnp.pad(a, ((0, rows - a.shape[0]), (0, cols - a.shape[1])))


def _device_kind() -> str:
    try:
        return jax.devices()[0].device_kind.lower()
    except Exception:
        return ""


def _bf16_transcendentals_ok() -> bool:
    # v5e and older have no bf16 EUP/VPU; keep tanh in f32 there.
    kind = _device_kind()
    return bool(kind) and not any(t in kind for t in ("v2", "v3", "v4", "v5"))


def _two_tensorcores_per_chip() -> bool:
    return "v7" in _device_kind()


# ----------------------------------------------------------------------------- kernel
def _boxactor_mlp_kernel(obs_ref, w1_ref, b1_ref, w2_ref, b2_ref, w3_ref, b3_ref,
                         out_ref, *, mxu_dtype, act_dtype, action_dim):
    # obs arrives f32; cast to MXU operand dtype in VMEM (no wrapper cast pass).
    x = obs_ref[...].astype(mxu_dtype)

    z1 = jnp.dot(x, w1_ref[...], preferred_element_type=jnp.float32) + b1_ref[...]
    h1 = jnp.tanh(z1.astype(act_dtype)).astype(mxu_dtype)

    z2 = jnp.dot(h1, w2_ref[...], preferred_element_type=jnp.float32) + b2_ref[...]
    h2 = jnp.tanh(z2.astype(act_dtype)).astype(mxu_dtype)

    # Third matmul stays 128-lane wide in VMEM; only the real action columns are
    # stored to HBM (out_ref last dim == action_dim == full array extent -> legal).
    acc = jnp.dot(h2, w3_ref[...], preferred_element_type=jnp.float32) + b3_ref[...]
    out_ref[...] = acc[:, :action_dim].astype(out_ref.dtype)


# ------------------------------------------------------------------------ param setup
def prepare_pallas_params(raw, *, use_bf16_mxu: bool = True):
    """Pad hidden/action dims to 128 lanes and cast weights once (amortized setup)."""
    w1, b1, w2, b2, w3, b3 = (raw["w1"], raw["b1"], raw["w2"], raw["b2"],
                              raw["w3"], raw["b3"])
    F, H = w1.shape
    A = w3.shape[1]
    Hp = _round_up(max(H, _LANE), _LANE)
    Ap = _round_up(max(A, _LANE), _LANE)
    mxu_dtype = jnp.bfloat16 if use_bf16_mxu else jnp.float32
    return {
        "w1": _pad2(w1, F, Hp).astype(mxu_dtype),
        "b1": _pad2(b1, 1, Hp).astype(jnp.float32),
        "w2": _pad2(w2, Hp, Hp).astype(mxu_dtype),
        "b2": _pad2(b2, 1, Hp).astype(jnp.float32),
        "w3": _pad2(w3, Hp, Ap).astype(mxu_dtype),
        "b3": _pad2(b3, 1, Ap).astype(jnp.float32),
    }


def init_box_actor_params(key, feature_dim, hidden_dim, action_dim, *,
                          use_bf16_mxu: bool = True):
    """Deterministic synthetic init matching the nn.Linear shapes of BoxActor.

    PyTorch stores Linear weight as (out, in); we generate in that layout and
    transpose, so semantics (y = x @ W.T + b) are preserved.
    """
    ks = jax.random.split(key, 6)

    def linear(kw, kb, fan_in, fan_out):
        bound = 1.0 / jnp.sqrt(fan_in)
        w_torch = jax.random.uniform(kw, (fan_out, fan_in), jnp.float32, -bound, bound)
        b = jax.random.uniform(kb, (fan_out,), jnp.float32, -bound, bound)
        return w_torch.T, b.reshape(1, fan_out)

    w1, b1 = linear(ks[0], ks[1], feature_dim, hidden_dim)
    w2, b2 = linear(ks[2], ks[3], hidden_dim, hidden_dim)
    w3, b3 = linear(ks[4], ks[5], hidden_dim, action_dim)
    # actor_logstd (1, action_dim) is only used by get_policy_outputs, not forward():
    # it stays in plain JAX (std = exp(logstd) broadcast to mu.shape).
    raw = {"w1": w1, "b1": b1, "w2": w2, "b2": b2, "w3": w3, "b3": b3,
           "logstd": jnp.ones((1, action_dim), jnp.float32)}
    return {"raw": raw, "pallas": prepare_pallas_params(raw, use_bf16_mxu=use_bf16_mxu)}


# ----------------------------------------------------------------------------- forward
def _reference_forward_f32(obs, raw):
    h1 = jnp.tanh(obs @ raw["w1"] + raw["b1"])
    h2 = jnp.tanh(h1 @ raw["w2"] + raw["b2"])
    return h2 @ raw["w3"] + raw["b3"]


def box_actor_forward(obs, params, *, block_b: int = 2048,
                      min_batch_for_kernel: int = 64, tanh_in_bf16=None):
    """Pallas forward for BoxActor with vector observations.

    obs:    (B, feature_dim) float32
    params: dict with "raw" (f32, PyTorch-equivalent) and "pallas" (padded/cast) trees.
    returns mu: (B, action_dim) float32
    """
    raw, pp = params["raw"], params["pallas"]
    B, F = obs.shape
    A = raw["w3"].shape[1]

    # Tiny-batch deployment shapes: the plain fused XLA path beats any kernel launch.
    if B < min_batch_for_kernel:
        return _reference_forward_f32(obs, raw)

    w1p, b1p, w2p, b2p, w3p, b3p = (pp["w1"], pp["b1"], pp["w2"], pp["b2"],
                                    pp["w3"], pp["b3"])
    Hp = w1p.shape[1]
    Ap = w3p.shape[1]
    mxu_dtype = w1p.dtype
    use_bf16_act = (mxu_dtype == jnp.bfloat16 and
                    (_bf16_transcendentals_ok() if tanh_in_bf16 is None
                     else bool(tanh_in_bf16)))
    act_dtype = jnp.bfloat16 if use_bf16_act else jnp.float32

    # ---- batch tiling: minimise padding; >=2 steps on v7x so both TCs are used ----
    min_steps = 2 if (_two_tensorcores_per_chip() and B >= 16) else 1
    n_steps = max(pl.cdiv(B, block_b), min_steps)
    TB = _round_up(pl.cdiv(B, n_steps), 8)
    Bp = n_steps * TB
    obs_p = jnp.pad(obs, ((0, Bp - B), (0, 0)))     # stays f32; cast happens in-kernel

    # Weights / biases: full-extent blocks with constant index_map -> VMEM-resident
    # across all batch steps (no re-DMA).
    const = lambda arr: pl.BlockSpec(arr.shape, lambda i: (0, 0))

    param_bytes = sum(a.size * a.dtype.itemsize
                      for a in (w1p, b1p, w2p, b2p, w3p, b3p))
    cost = pl.CostEstimate(
        flops=2 * Bp * (F * Hp + Hp * Hp + Hp * Ap),
        transcendentals=2 * Bp * Hp,
        bytes_accessed=Bp * F * 4 + param_bytes + Bp * A * 4,
    )

    kernel = functools.partial(_boxactor_mlp_kernel, mxu_dtype=mxu_dtype,
                               act_dtype=act_dtype, action_dim=A)

    mu = pl.pallas_call(
        kernel,
        out_shape=jax.ShapeDtypeStruct((Bp, A), jnp.float32),
        grid_spec=pltpu.PrefetchScalarGridSpec(
            num_scalar_prefetch=0,
            grid=(n_steps,),
            in_specs=[
                pl.BlockSpec((TB, F), lambda i: (i, 0)),   # obs stream (double-buffered)
                const(w1p), const(b1p),
                const(w2p), const(b2p),
                const(w3p), const(b3p),
            ],
            out_specs=pl.BlockSpec((TB, A), lambda i: (i, 0)),
        ),
        compiler_params=pltpu.CompilerParams(
            dimension_semantics=("parallel",),   # shards batch steps across TCs on v7x
        ),
        cost_estimate=cost,
    )(obs_p, w1p, b1p, w2p, b2p, w3p, b3p)

    # Strip only the batch padding (action dim already un-padded in HBM).
    return mu[:B]


if __name__ == "__main__":
    # Small shapes consistent with the module: obs_shape=(32,) -> vector-obs MLP branch.
    batch = 24
    feature_dim = 32
    hidden_dim = 32
    action_dim = 4

    key = jax.random.PRNGKey(0)
    k_obs, k_par = jax.random.split(key)
    obs = jax.random.normal(k_obs, (batch, feature_dim), jnp.float32)

    # ---- exact f32 MXU path (kernel forced on despite small batch) ----
    params_f32 = init_box_actor_params(k_par, feature_dim, hidden_dim, action_dim,
                                       use_bf16_mxu=False)
    ref_f32 = _reference_forward_f32(obs, params_f32["raw"])
    mu_f32 = jax.block_until_ready(
        box_actor_forward(obs, params_f32, min_batch_for_kernel=0))
    assert mu_f32.shape == (batch, action_dim)
    assert jnp.allclose(mu_f32, ref_f32, atol=1e-5, rtol=1e-5)

    # ---- bf16-MXU path with a small batch tile to exercise the multi-step grid ----
    params_bf16 = init_box_actor_params(k_par, feature_dim, hidden_dim, action_dim,
                                        use_bf16_mxu=True)
    mu_bf16 = jax.block_until_ready(
        box_actor_forward(obs, params_bf16, min_batch_for_kernel=0, block_b=8))
    assert mu_bf16.shape == (batch, action_dim)
    assert jnp.allclose(mu_bf16, ref_f32, atol=5e-2, rtol=5e-2)

    # ---- default small-batch fallback (plain fused XLA path) ----
    mu_small = jax.block_until_ready(box_actor_forward(obs[:8], params_f32))
    assert jnp.allclose(mu_small, ref_f32[:8], atol=1e-5, rtol=1e-5)

    # get_policy_outputs would additionally return exp(logstd) broadcast to mu's
    # shape — pure elementwise glue, kept in plain JAX:
    _std = jnp.exp(jnp.broadcast_to(params_f32["raw"]["logstd"], mu_f32.shape))

    print("KERNEL_OK")
</pallas_src>

<mosaic_0001>
module attributes {stable_mosaic.version = 11 : i64} {
  func.func @_boxactor_mlp_kernel(%arg0: i32, %arg1: memref<24x32xf32, #tpu.memory_space<vmem>>, %arg2: memref<32x128xf32, #tpu.memory_space<vmem>>, %arg3: memref<1x128xf32, #tpu.memory_space<vmem>>, %arg4: memref<128x128xf32, #tpu.memory_space<vmem>>, %arg5: memref<1x128xf32, #tpu.memory_space<vmem>>, %arg6: memref<128x128xf32, #tpu.memory_space<vmem>>, %arg7: memref<1x128xf32, #tpu.memory_space<vmem>>, %arg8: memref<24x4xf32, #tpu.memory_space<vmem>>) attributes {dimension_semantics = [#tpu.dimension_semantics<parallel>], iteration_bounds = array<i64: 1>, scalar_prefetch = 0 : i64, scratch_operands = 0 : i64, tpu.core_type = #tpu.core_type<tc>, window_params = [{transform_indices = @transform_0, window_bounds = array<i64: 24, 32>}, {pipeline_mode = #tpu.pipeline_mode<synchronous>, transform_indices = @transform_1, window_bounds = array<i64: 32, 128>}, {pipeline_mode = #tpu.pipeline_mode<synchronous>, transform_indices = @transform_2, window_bounds = array<i64: 1, 128>}, {pipeline_mode = #tpu.pipeline_mode<synchronous>, transform_indices = @transform_3, window_bounds = array<i64: 128, 128>}, {pipeline_mode = #tpu.pipeline_mode<synchronous>, transform_indices = @transform_4, window_bounds = array<i64: 1, 128>}, {pipeline_mode = #tpu.pipeline_mode<synchronous>, transform_indices = @transform_5, window_bounds = array<i64: 128, 128>}, {pipeline_mode = #tpu.pipeline_mode<synchronous>, transform_indices = @transform_6, window_bounds = array<i64: 1, 128>}, {transform_indices = @transform_7, window_bounds = array<i64: 24, 4>}]} {
    %c0 = arith.constant 0 : index
    %c0_0 = arith.constant 0 : index
    %0 = vector.load %arg1[%c0, %c0_0] : memref<24x32xf32, #tpu.memory_space<vmem>>, vector<24x32xf32>
    %c0_1 = arith.constant 0 : index
    %c0_2 = arith.constant 0 : index
    %1 = vector.load %arg2[%c0_1, %c0_2] : memref<32x128xf32, #tpu.memory_space<vmem>>, vector<32x128xf32>
    %cst = arith.constant dense<0.000000e+00> : vector<24x128xf32>
    %2 = tpu.matmul %0, %1, %cst {dimension_numbers = #tpu.dot_dimension_numbers<[1], [0], [0], [1], [0, 0, 1, 1], [], []>} : vector<24x32xf32>, vector<32x128xf32>, vector<24x128xf32> -> vector<24x128xf32>
    %c0_3 = arith.constant 0 : index
    %c0_4 = arith.constant 0 : index
    %3 = vector.load %arg3[%c0_3, %c0_4] : memref<1x128xf32, #tpu.memory_space<vmem>>, vector<1x128xf32>
    %4 = vector.broadcast %3 : vector<1x128xf32> to vector<24x128xf32>
    %5 = arith.addf %2, %4 : vector<24x128xf32>
    %6 = math.tanh %5 : vector<24x128xf32>
    %c0_5 = arith.constant 0 : index
    %c0_6 = arith.constant 0 : index
    %7 = vector.load %arg4[%c0_5, %c0_6] : memref<128x128xf32, #tpu.memory_space<vmem>>, vector<128x128xf32>
    %cst_7 = arith.constant dense<0.000000e+00> : vector<24x128xf32>
    %8 = tpu.matmul %6, %7, %cst_7 {dimension_numbers = #tpu.dot_dimension_numbers<[1], [0], [0], [1], [0, 0, 1, 1], [], []>} : vector<24x128xf32>, vector<128x128xf32>, vector<24x128xf32> -> vector<24x128xf32>
    %c0_8 = arith.constant 0 : index
    %c0_9 = arith.constant 0 : index
    %9 = vector.load %arg5[%c0_8, %c0_9] : memref<1x128xf32, #tpu.memory_space<vmem>>, vector<1x128xf32>
    %10 = vector.broadcast %9 : vector<1x128xf32> to vector<24x128xf32>
    %11 = arith.addf %8, %10 : vector<24x128xf32>
    %12 = math.tanh %11 : vector<24x128xf32>
    %c0_10 = arith.constant 0 : index
    %c0_11 = arith.constant 0 : index
    %13 = vector.load %arg6[%c0_10, %c0_11] : memref<128x128xf32, #tpu.memory_space<vmem>>, vector<128x128xf32>
    %cst_12 = arith.constant dense<0.000000e+00> : vector<24x128xf32>
    %14 = tpu.matmul %12, %13, %cst_12 {dimension_numbers = #tpu.dot_dimension_numbers<[1], [0], [0], [1], [0, 0, 1, 1], [], []>} : vector<24x128xf32>, vector<128x128xf32>, vector<24x128xf32> -> vector<24x128xf32>
    %c0_13 = arith.constant 0 : index
    %c0_14 = arith.constant 0 : index
    %15 = vector.load %arg7[%c0_13, %c0_14] : memref<1x128xf32, #tpu.memory_space<vmem>>, vector<1x128xf32>
    %16 = vector.broadcast %15 : vector<1x128xf32> to vector<24x128xf32>
    %17 = arith.addf %14, %16 : vector<24x128xf32>
    %18 = vector.extract_strided_slice %17 {offsets = [0, 0], sizes = [24, 4], strides = [1, 1]} : vector<24x128xf32> to vector<24x4xf32>
    %c0_15 = arith.constant 0 : index
    %c0_16 = arith.constant 0 : index
    %19 = vector.load %arg8[%c0_15, %c0_16] : memref<24x4xf32, #tpu.memory_space<vmem>>, vector<24x4xf32>
    tpu.vector_store %arg8[%c0_15, %c0_16], %18 {strides = array<i32>} : memref<24x4xf32, #tpu.memory_space<vmem>>, vector<24x4xf32>,
    return
  }
  func.func @transform_0(%arg0: i32) -> (i32, i32) {
    %c0_i32 = arith.constant 0 : i32
    %c0_i32_0 = arith.constant 0 : i32
    return %arg0, %c0_i32 : i32, i32
  }
  func.func @transform_1(%arg0: i32) -> (i32, i32) {
    %c0_i32 = arith.constant 0 : i32
    %c0_i32_0 = arith.constant 0 : i32
    %c0_i32_1 = arith.constant 0 : i32
    return %c0_i32, %c0_i32_0 : i32, i32
  }
  func.func @transform_2(%arg0: i32) -> (i32, i32) {
    %c0_i32 = arith.constant 0 : i32
    %c0_i32_0 = arith.constant 0 : i32
    %c0_i32_1 = arith.constant 0 : i32
    return %c0_i32, %c0_i32_0 : i32, i32
  }
  func.func @transform_3(%arg0: i32) -> (i32, i32) {
    %c0_i32 = arith.constant 0 : i32
    %c0_i32_0 = arith.constant 0 : i32
    %c0_i32_1 = arith.constant 0 : i32
    return %c0_i32, %c0_i32_0 : i32, i32
  }
  func.func @transform_4(%arg0: i32) -> (i32, i32) {
    %c0_i32 = arith.constant 0 : i32
    %c0_i32_0 = arith.constant 0 : i32
    %c0_i32_1 = arith.constant 0 : i32
    return %c0_i32, %c0_i32_0 : i32, i32
  }
  func.func @transform_5(%arg0: i32) -> (i32, i32) {
    %c0_i32 = arith.constant 0 : i32
    %c0_i32_0 = arith.constant 0 : i32
    %c0_i32_1 = arith.constant 0 : i32
    return %c0_i32, %c0_i32_0 : i32, i32
  }
  func.func @transform_6(%arg0: i32) -> (i32, i32) {
    %c0_i32 = arith.constant 0 : i32
    %c0_i32_0 = arith.constant 0 : i32
    %c0_i32_1 = arith.constant 0 : i32
    return %c0_i32, %c0_i32_0 : i32, i32
  }
  func.func @transform_7(%arg0: i32) -> (i32, i32) {
    %c0_i32 = arith.constant 0 : i32
    %c0_i32_0 = arith.constant 0 : i32
    return %arg0, %c0_i32 : i32, i32
  }
}

</mosaic_0001>

<bundles_post_ra>
// kernel: tpu_custom_call.1
= control target key start
LH: loop header
LB: loop body
LE: loop exit
PB: predicated region body
PF: predicated region fallthrough
CT: control target
= control target key end

     0   :  { %12 = vsyncpa [#allocation3], 0  ;;  %s482_s0 = inlined_call_operand.hbm [shape: f32[24,32], index: 0, kind: input, shape index: {}]   ;;  %s483_s1 = inlined_call_operand.hbm [shape: f32[32,128], index: 1, kind: input, shape index: {}]   ;;  %s484_s2 = inlined_call_operand.vmem [shape: f32[1,128], index: 2, kind: input, shape index: {}]   ;;  %s485_s3 = inlined_call_operand.hbm [shape: f32[128,128], index: 3, kind: input, shape index: {}]   ;;  %s486_s4 = inlined_call_operand.vmem [shape: f32[1,128], index: 4, kind: input, shape index: {}]   ;;  %s487_s5 = inlined_call_operand.hbm [shape: f32[128,128], index: 5, kind: input, shape index: {}]   ;;  %s488_s6 = inlined_call_operand.vmem [shape: f32[1,128], index: 6, kind: input, shape index: {}]   ;;  %s489_s7 = inlined_call_operand.vmem [shape: f32[24,4], index: 7, kind: output, shape index: {}]  }
   0x1   :  { %13 = vsyncpa [#allocation5], 0 }
   0x2   :  { %14 = vsyncpa [#allocation8], 0  ;;  %s32_s26 = sshll.u32 %s483_s1, 4  ;;  %s403_s27 = smov [#allocation4]   ;;  %s33_s26 = int_to_ptr.hbm [resolvable:$true] %s32_s26 }
   0x3   :  { %s34_s28 = sshll.u32 %s403_s27, 4  ;;  %s19_s8 = sshll.u32 %s482_s0, 4  ;;  %s35_s28 = int_to_ptr.vmem [resolvable:$true] %s34_s28  ;;  %s20_s8 = int_to_ptr.hbm [resolvable:$true] %s19_s8 }
   0x4   :  { %s404_s9 = smov 128   ;;  %s405_s10 = smov 8  }
   0x5   :  { %40 = dma.hbm_to_vmem [thread:$0]  %s33_s26, 512, %s35_s28, [#allocation5], %s404_s9, %s404_s9, %s405_s10  }
   0x6   :  { %s406_s11 = smov [#allocation2]   ;;  %s47_s15 = sshll.u32 %s485_s3, 4  ;;  %s48_s15 = int_to_ptr.hbm [resolvable:$true] %s47_s15 }
   0x7   :  { %s21_s12 = sshll.u32 %s406_s11, 4  ;;  %s62_s17 = sshll.u32 %s487_s5, 4  ;;  %s22_s12 = int_to_ptr.vmem [resolvable:$true] %s21_s12  ;;  %s63_s17 = int_to_ptr.hbm [resolvable:$true] %s62_s17 }
   0x8   :  { %27 = dma.hbm_to_vmem [thread:$0]  %s20_s8, 384, %s22_s12, [#allocation3], %s404_s9, %s404_s9, %s405_s10  }
   0x9   :  { %s407_s18 = smov [#allocation6]   ;;  %s408_s0 = smov [#allocation7]  }
   0xa   :  { %s49_s19 = sshll.u32 %s407_s18, 4  ;;  %s64_s20 = sshll.u32 %s408_s0, 4  ;;  %s50_s19 = int_to_ptr.vmem [resolvable:$true] %s49_s19  ;;  %s65_s20 = int_to_ptr.vmem [resolvable:$true] %s64_s20 }
   0xb   :  { %55 = dma.hbm_to_vmem [thread:$0]  %s48_s15, 2048, %s50_s19, [#allocation5], %s404_s9, %s404_s9, %s405_s10  }
   0xc   :  { %70 = dma.hbm_to_vmem [thread:$0]  %s63_s17, 2048, %s65_s20, [#allocation8], %s404_s9, %s404_s9, %s405_s10  }
   0xd   :  { %397 = dma.done.wait [#allocation3], 384  }
   0xe   :  { %398 = vsyncadd [#allocation3], 4294966912 }
   0xf   :  { %399 = dma.done.wait [#allocation5], 2560  }
  0x10   :  { %400 = vsyncadd [#allocation5], 4294964736 }
  0x11   :  { %401 = dma.done.wait [#allocation8], 2048  }
  0x12   :  { %402 = vsyncadd [#allocation8], 4294965248  ;;  %v95_v0 = vld [vmem:[#allocation4 + $0x18] sm:$0xff]  ;;  %v94_v1 = vld [vmem:[#allocation4 + $0x10] sm:$0xff]  ;;  %vm100_vm0 = vcmask 261120   ;;  %vm234_vm1 = vcmask 31744  }
  0x13   :  { %122 = vmatpush.msra.mxu0 %v95_v0  ;;  %v93_v2 = vld [vmem:[#allocation4 + $0x8] sm:$0xff]  ;;  %v154_v3 = vld [vmem:[#allocation6 + $0x78] sm:$0xff]  ;;  %v153_v4 = vld [vmem:[#allocation6 + $0x70] sm:$0xff] }
  0x14   :  { %159 = vmatpush.msra.mxu1 %v154_v3  ;;  %v92_v5 = vld [vmem:[#allocation4] sm:$0xff]  ;;  %v152_v6 = vld [vmem:[#allocation6 + $0x68] sm:$0xff]  ;;  %248 = vmatpush.msra.mxu3 %v154_v3  ;;  %v150_v9 = vld [vmem:[#allocation6 + $0x58] sm:$0xff] }
  0x15   :  { %123 = vmatpush.msra.mxu0 %v94_v1  ;;  %v89_v7 = vld [vmem:[#allocation2] sm:$0xff]  ;;  %v151_v8 = vld [vmem:[#allocation6 + $0x60] sm:$0xff]  ;;  %v149_v10 = vld [vmem:[#allocation6 + $0x50] sm:$0xff] }
  0x16   :  { %160 = vmatpush.msra.mxu1 %v153_v4  ;;  %249 = vmatpush.msra.mxu3 %v153_v4  ;;  %v148_v11 = vld [vmem:[#allocation6 + $0x48] sm:$0xff]  ;;  %v90_v12 = vld [vmem:[#allocation2 + $0x8] sm:$0xff]  ;;  %v147_v13 = vld [vmem:[#allocation6 + $0x40] sm:$0xff] }
  0x17   :  { %124 = vmatpush.msra.mxu0 %v93_v2  ;;  %v146_v14 = vld [vmem:[#allocation6 + $0x38] sm:$0xff]  ;;  %v145_v15 = vld [vmem:[#allocation6 + $0x30] sm:$0xff]  ;;  %v144_v16 = vld [vmem:[#allocation6 + $0x28] sm:$0xff] }
  0x18   :  { %161 = vmatpush.msra.mxu1 %v152_v6  ;;  %250 = vmatpush.msra.mxu3 %v152_v6  ;;  %v91_v17 = vld [vmem:[#allocation2 + $0x10] sm:$0xff]  ;;  %v143_v18 = vld [vmem:[#allocation6 + $0x20] sm:$0xff]  ;;  %v141_v20 = vld [vmem:[#allocation6 + $0x10] sm:$0xff] }
  0x19   :  { %125 = vmatpush.msra.mxu0 %v92_v5  ;;  %v142_v19 = vld [vmem:[#allocation6 + $0x18] sm:$0xff]  ;;  %v140_v21 = vld [vmem:[#allocation6 + $0x8] sm:$0xff]  ;;  %v139_v22 = vld [vmem:[#allocation6] sm:$0xff] }
  0x1a   :  { %245 = vmatmul.msk.f32.vlgmr.msra.gmra.mxu0 %vm100_vm0, %v89_v7  ;;  %162 = vmatpush.msra.mxu1 %v151_v8  ;;  %v203_v23 = vld [vmem:[#allocation7 + $0x78] sm:$0xff]  ;;  %v202_v24 = vld [vmem:[#allocation7 + $0x70] sm:$0xff]  ;;  %v201_v25 = vld [vmem:[#allocation7 + $0x68] sm:$0xff] }
  0x1b   :  { %251 = vmatpush.msra.mxu3 %v151_v8  ;;  %208 = vmatpush.msrb.mxu0 %v203_v23  ;;  %v286_v26 = vld [vmem:[%s484_s2] ss:$0 sm:$0xff]  ;;  %v200_v27 = vld [vmem:[#allocation7 + $0x60] sm:$0xff]  ;;  %v199_v29 = vld [vmem:[#allocation7 + $0x58] sm:$0xff] }
  0x1c   :  { %163 = vmatpush.msra.mxu1 %v150_v9  ;;  %264 = vmatpush.msra.mxu2 %v203_v23  ;;  %v198_v31 = vld [vmem:[#allocation7 + $0x50] sm:$0xff]  ;;  %v197_v32 = vld [vmem:[#allocation7 + $0x48] sm:$0xff]  ;;  %v196_v33 = vld [vmem:[#allocation7 + $0x40] sm:$0xff] }
  0x1d   :  { %252 = vmatpush.msra.mxu3 %v150_v9  ;;  %209 = vmatpush.msrb.mxu0 %v202_v24  ;;  %v195_v35 = vld [vmem:[#allocation7 + $0x38] sm:$0xff]  ;;  %v194_v38 = vld [vmem:[#allocation7 + $0x30] sm:$0xff]  ;;  %v193_v39 = vld [vmem:[#allocation7 + $0x28] sm:$0xff] }
  0x1e   :  { %164 = vmatpush.msra.mxu1 %v149_v10  ;;  %265 = vmatpush.msra.mxu2 %v202_v24  ;;  %v192_v44 = vld [vmem:[#allocation7 + $0x20] sm:$0xff]  ;;  %v191_v45 = vld [vmem:[#allocation7 + $0x18] sm:$0xff]  ;;  %v190_v46 = vld [vmem:[#allocation7 + $0x10] sm:$0xff] }
  0x1f   :  { %253 = vmatpush.msra.mxu3 %v149_v10  ;;  %210 = vmatpush.msrb.mxu0 %v201_v25  ;;  %v189_v47 = vld [vmem:[#allocation7 + $0x8] sm:$0xff]  ;;  %v188_v48 = vld [vmem:[#allocation7] sm:$0xff] }
  0x20   :  { %165 = vmatpush.msra.mxu1 %v148_v11  ;;  %266 = vmatpush.msra.mxu2 %v201_v25  ;;  %v287_v49 = vld [vmem:[%s486_s4] ss:$0 sm:$0xff] }
  0x21   :  { %254 = vmatpush.msra.mxu3 %v148_v11  ;;  %211 = vmatpush.msrb.mxu0 %v200_v27  ;;  %v288_v59 = vld [vmem:[%s488_s6] ss:$0 sm:$0xff] }
  0x22   :  { %246 = vmatmul.msk.f32.gmra.mxu0 %vm100_vm0, %v90_v12  ;;  %166 = vmatpush.msra.mxu1 %v147_v13 }
  0x23   :  { %255 = vmatpush.msra.mxu3 %v147_v13  ;;  %267 = vmatpush.msra.mxu2 %v200_v27 }
  0x24   :  { %167 = vmatpush.msra.mxu1 %v146_v14  ;;  %212 = vmatpush.msrb.mxu0 %v199_v29 }
  0x25   :  { %256 = vmatpush.msra.mxu3 %v146_v14  ;;  %268 = vmatpush.msra.mxu2 %v199_v29 }
  0x26   :  { %168 = vmatpush.msra.mxu1 %v145_v15  ;;  %213 = vmatpush.msrb.mxu0 %v198_v31 }
  0x27   :  { %257 = vmatpush.msra.mxu3 %v145_v15  ;;  %269 = vmatpush.msra.mxu2 %v198_v31 }
  0x28   :  { %169 = vmatpush.msra.mxu1 %v144_v16  ;;  %214 = vmatpush.msrb.mxu0 %v197_v32 }
  0x29   :  { %258 = vmatpush.msra.mxu3 %v144_v16  ;;  %270 = vmatpush.msra.mxu2 %v197_v32 }
  0x2a   :  { %247 = vmatmul.msk.f32.gmra.mxu0 %vm100_vm0, %v91_v17  ;;  %170 = vmatpush.msra.mxu1 %v143_v18 }
  0x2b   :  { %259 = vmatpush.msra.mxu3 %v143_v18  ;;  %215 = vmatpush.msrb.mxu0 %v196_v33 }
  0x2c   :  { %171 = vmatpush.msra.mxu1 %v142_v19  ;;  %271 = vmatpush.msra.mxu2 %v196_v33 }
  0x2d   :  { %260 = vmatpush.msra.mxu3 %v142_v19  ;;  %216 = vmatpush.msrb.mxu0 %v195_v35 }
  0x2e   :  { %172 = vmatpush.msra.mxu1 %v141_v20  ;;  %272 = vmatpush.msra.mxu2 %v195_v35 }
  0x2f   :  { %261 = vmatpush.msra.mxu3 %v141_v20  ;;  %217 = vmatpush.msrb.mxu0 %v194_v38 }
  0x30   :  { %173 = vmatpush.msra.mxu1 %v140_v21  ;;  %273 = vmatpush.msra.mxu2 %v194_v38 }
  0x31   :  { %262 = vmatpush.msra.mxu3 %v140_v21  ;;  %218 = vmatpush.msrb.mxu0 %v193_v39 }
  0x32   :  { %174 = vmatpush.msra.mxu1 %v139_v22  ;;  %274 = vmatpush.msra.mxu2 %v193_v39 }
  0x33   :  { %263 = vmatpush.msra.mxu3 %v139_v22  ;;  %219 = vmatpush.msrb.mxu0 %v192_v44 }
  0x34   :  { %275 = vmatpush.msra.mxu2 %v192_v44 }
  0x35   :  { %220 = vmatpush.msrb.mxu0 %v191_v45 }
  0x36   :  { %276 = vmatpush.msra.mxu2 %v191_v45 }
  0x37   :  { %221 = vmatpush.msrb.mxu0 %v190_v46 }
  0x38   :  { %277 = vmatpush.msra.mxu2 %v190_v46 }
  0x39   :  { %222 = vmatpush.msrb.mxu0 %v189_v47 }
  0x3a   :  { %278 = vmatpush.msra.mxu2 %v189_v47 }
  0x3b   :  { %223 = vmatpush.msrb.mxu0 %v188_v48 }
  0x3c   :  { %279 = vmatpush.msra.mxu2 %v188_v48 }
  0x97   :  { %v127_v28 = vpop.f32.mrf.mxu0 }
  0x98   :  { %v128_v30 = vadd.f32 %v286_v26, %v127_v28 }
  0x9a   :  { %289 = vtanh.f32 %v128_v30 }
  0x9f   :  { %v130_v34 = vpop.f32.mrf.mxu0 }
  0xa0   :  { %v290_v36 = vpop.eup %289  ;;  %v131_v37 = vadd.f32 %v286_v26, %v130_v34 }
  0xa1   :  { %175 = vmatmul.f32.vlgmr.msra.gmra.mxu1 %v290_v36 }
  0xa2   :  { %291 = vtanh.f32 %v131_v37 }
  0xa7   :  { %v133_v40 = vpop.f32.mrf.mxu0 }
  0xa8   :  { %v292_v41 = vpop.eup %291  ;;  %v134_v42 = vadd.f32 %v286_v26, %v133_v40 }
  0xa9   :  { %178 = vmatmul.f32.vlgmr.msra.gmra.mxu3 %v292_v41 }
  0xaa   :  { %293 = vtanh.f32 %v134_v42 }
  0xb0   :  { %v294_v43 = vpop.eup %293 }
  0xb1   :  { %181 = vmatmul.f32.gmra.mxu3 %v294_v43 }
 0x11e   :  { %v176_v50 = vpop.f32.mrf.mxu1 }
 0x11f   :  { %v177_v51 = vadd.f32 %v287_v49, %v176_v50 }
 0x121   :  { %295 = vtanh.f32 %v177_v51 }
 0x127   :  { %v296_v52 = vpop.eup %295 }
 0x128   :  { %224 = vmatmul.f32.vlgmr.msrb.gmra.mxu0 %v296_v52 }
 0x12c   :  { %v179_v53 = vpop.f32.mrf.mxu3 }
 0x12d   :  { %v180_v54 = vadd.f32 %v287_v49, %v179_v53 }
 0x12f   :  { %297 = vtanh.f32 %v180_v54 }
 0x134   :  { %v182_v55 = vpop.f32.mrf.mxu3 }
 0x135   :  { %v298_v56 = vpop.eup %297  ;;  %v183_v57 = vadd.f32 %v287_v49, %v182_v55 }
 0x136   :  { %227 = vmatmul.f32.vlgmr.msra.gmra.mxu2 %v298_v56 }
 0x137   :  { %299 = vtanh.f32 %v183_v57 }
 0x13d   :  { %v300_v58 = vpop.eup %299 }
 0x13e   :  { %230 = vmatmul.f32.gmra.mxu2 %v300_v58 }
 0x1a5   :  { %v225_v60 = vpop.f32.mrf.mxu0 }
 0x1a6   :  { %v226_v61 = vadd.f32 %v288_v59, %v225_v60 }
 0x1a8   :  { %235 = vst.msk [vmem:[%s489_s7] sm:$0xff] %vm234_vm1, %v226_v61 }
 0x1b9   :  { %v228_v62 = vpop.f32.mrf.mxu2 }
 0x1ba   :  { %v229_v63 = vadd.f32 %v288_v59, %v228_v62 }
 0x1bc   :  { %236 = vst.msk [vmem:[%s489_s7 + $0x8] sm:$0xff] %vm234_vm1, %v229_v63 }
 0x1c1   :  { %v231_v0 = vpop.f32.mrf.mxu2 }
 0x1c2   :  { %v232_v1 = vadd.f32 %v288_v59, %v231_v0 }
 0x1c4   :  { %237 = vst.msk [vmem:[%s489_s7 + $0x10] sm:$0xff] %vm234_vm1, %v232_v1 }
 0x1c5   :  { %242 = vsyncpa [#allocation3], 1 }
 0x1c6   :  { %243 = vsyncpa [#allocation5], 1 }
 0x1c7   :  { %244 = vsyncpa [#allocation8], 1 }

</bundles_post_ra>
